<compile_context>
chip_gen: v7x
topology: tpu7x:2x2x1
jax: 0.10.0
libtpu: 0.0.40
codegen_flags: <defaults>
</compile_context>

<pallas_src>
import functools

import jax
import jax.numpy as jnp
from jax.experimental import pallas as pl
from jax.experimental.pallas import tpu as pltpu


# ----------------------------------------------------------------------------
# Single-pass kernel: one whole (HW, C) image slab per grid step.
# ----------------------------------------------------------------------------
def _se_single_pass_kernel(x_ref, w1_ref, b1_ref, w2_ref, b2_ref, o_ref):
    # x_ref/o_ref: (1, HW, C)  w1: (C, Ch)  b1: (1, Ch)  w2: (Ch, C)  b2: (1, C)
    x = x_ref[0]                                            # (HW, C), input dtype
    hw = x.shape[0]

    # --- squeeze: global average pool as a ones-row matvec on the idle MXU.
    # f32 accumulation without materializing an f32 copy of the slab.
    ones_row = jnp.ones((1, hw), dtype=x.dtype)
    y = jnp.dot(ones_row, x, preferred_element_type=jnp.float32) * (1.0 / hw)  # (1, C)

    # --- excitation MLP (tiny FLOPs; MXU shape-efficiency irrelevant here) ---
    h = jnp.maximum(
        jnp.dot(y, w1_ref[...], preferred_element_type=jnp.float32) + b1_ref[...],
        0.0)
    z = jax.nn.sigmoid(
        jnp.dot(h, w2_ref[...], preferred_element_type=jnp.float32) + b2_ref[...])  # (1, C)

    # --- rescale: z is lane-aligned with C; broadcast over sublanes (HW) is free.
    # Keep the big tensor in the input dtype (no f32 slab).
    o_ref[0] = x * z.astype(x.dtype)


def _se_single_pass(x_bhwc, w1, b1_2d, w2, b2_2d, *, vmem_limit_bytes):
    B, HW, C = x_bhwc.shape
    Ch = w1.shape[1]
    return pl.pallas_call(
        _se_single_pass_kernel,
        out_shape=jax.ShapeDtypeStruct((B, HW, C), x_bhwc.dtype),
        grid_spec=pltpu.PrefetchScalarGridSpec(
            num_scalar_prefetch=0,
            grid=(B,),
            in_specs=[
                pl.BlockSpec((1, HW, C), lambda b: (b, 0, 0)),
                pl.BlockSpec((C, Ch), lambda b: (0, 0)),
                pl.BlockSpec((1, Ch), lambda b: (0, 0)),
                pl.BlockSpec((Ch, C), lambda b: (0, 0)),
                pl.BlockSpec((1, C), lambda b: (0, 0)),
            ],
            out_specs=pl.BlockSpec((1, HW, C), lambda b: (b, 0, 0)),
        ),
        compiler_params=pltpu.CompilerParams(
            dimension_semantics=("parallel",),
            vmem_limit_bytes=int(vmem_limit_bytes),
        ),
    )(x_bhwc, w1, b1_2d, w2, b2_2d)


# ----------------------------------------------------------------------------
# Two-pass fallback (VMEM-constrained shapes, e.g. v7x with large C*HW slabs).
# Pass 1: spatially tiled squeeze (f32 accumulation) + excitation MLP -> z.
# Pass 2: spatially tiled streaming channel-wise rescale.
# ----------------------------------------------------------------------------
def _se_squeeze_mlp_kernel(x_ref, w1_ref, b1_ref, w2_ref, b2_ref, z_ref,
                           acc_ref, *, inv_hw):
    t = pl.program_id(1)

    @pl.when(t == 0)
    def _init():
        acc_ref[...] = jnp.zeros_like(acc_ref)

    x = x_ref[0]                                            # (tile_hw, C)
    ones_row = jnp.ones((1, x.shape[0]), dtype=x.dtype)
    acc_ref[...] += jnp.dot(ones_row, x, preferred_element_type=jnp.float32)

    @pl.when(t == pl.num_programs(1) - 1)
    def _finalize():
        y = acc_ref[...] * inv_hw                           # (1, C), f32
        h = jnp.maximum(
            jnp.dot(y, w1_ref[...], preferred_element_type=jnp.float32) + b1_ref[...],
            0.0)
        z = jax.nn.sigmoid(
            jnp.dot(h, w2_ref[...], preferred_element_type=jnp.float32) + b2_ref[...])
        z_ref[0] = z.astype(z_ref.dtype)                    # (1, C)


def _se_rescale_kernel(x_ref, z_ref, o_ref):
    x = x_ref[...]                                          # (1, tile_hw, C)
    z = z_ref[...]                                          # (1, 1, C), f32
    o_ref[...] = x * z.astype(x.dtype)                      # sublane broadcast


def _pick_hw_tile(hw, c, elem, tile_budget_bytes):
    """Largest divisor of hw that is a multiple of 8 (or hw itself) whose
    double-buffered in+out tile footprint fits the budget."""
    smallest_legal = hw
    for d in range(hw, 0, -1):
        if hw % d:
            continue
        if d != hw and d % 8:
            continue
        if 4 * d * c * elem <= tile_budget_bytes:
            return d
        smallest_legal = d
    return smallest_legal


def _se_two_pass(x_bhwc, w1, b1_2d, w2, b2_2d, *, tile_budget_bytes):
    B, HW, C = x_bhwc.shape
    Ch = w1.shape[1]
    elem = jnp.dtype(x_bhwc.dtype).itemsize
    tile_hw = _pick_hw_tile(HW, C, elem, tile_budget_bytes)
    n_t = HW // tile_hw

    # Pass 1: squeeze + excitation MLP -> channel gates z (B, 1, C) in f32.
    z = pl.pallas_call(
        functools.partial(_se_squeeze_mlp_kernel, inv_hw=1.0 / HW),
        out_shape=jax.ShapeDtypeStruct((B, 1, C), jnp.float32),
        grid_spec=pltpu.PrefetchScalarGridSpec(
            num_scalar_prefetch=0,
            grid=(B, n_t),
            in_specs=[
                pl.BlockSpec((1, tile_hw, C), lambda b, t: (b, t, 0)),
                pl.BlockSpec((C, Ch), lambda b, t: (0, 0)),
                pl.BlockSpec((1, Ch), lambda b, t: (0, 0)),
                pl.BlockSpec((Ch, C), lambda b, t: (0, 0)),
                pl.BlockSpec((1, C), lambda b, t: (0, 0)),
            ],
            out_specs=pl.BlockSpec((1, 1, C), lambda b, t: (b, 0, 0)),
            scratch_shapes=[pltpu.VMEM((1, C), jnp.float32)],
        ),
        compiler_params=pltpu.CompilerParams(
            dimension_semantics=("parallel", "arbitrary"),
            vmem_limit_bytes=32 * 1024 * 1024,
        ),
    )(x_bhwc, w1, b1_2d, w2, b2_2d)

    # Pass 2: spatially tiled, lane-dense channel-wise rescale.
    out = pl.pallas_call(
        _se_rescale_kernel,
        out_shape=jax.ShapeDtypeStruct((B, HW, C), x_bhwc.dtype),
        grid_spec=pltpu.PrefetchScalarGridSpec(
            num_scalar_prefetch=0,
            grid=(B, n_t),
            in_specs=[
                pl.BlockSpec((1, tile_hw, C), lambda b, t: (b, t, 0)),
                pl.BlockSpec((1, 1, C), lambda b, t: (b, 0, 0)),
            ],
            out_specs=pl.BlockSpec((1, tile_hw, C), lambda b, t: (b, t, 0)),
        ),
        compiler_params=pltpu.CompilerParams(
            dimension_semantics=("parallel", "parallel"),
            vmem_limit_bytes=32 * 1024 * 1024,
        ),
    )(x_bhwc, z)

    return out


# ----------------------------------------------------------------------------
# Public wrapper (keeps the PyTorch-facing NCHW interface).
# ----------------------------------------------------------------------------
def se_attention(x_nchw, w1, b1, w2, b2, *, force_two_pass=False,
                 two_pass_tile_budget_bytes=16 * 1024 * 1024):
    """x_nchw: (B, C, H, W). Weights follow the y @ W + b convention
    (W1: (C, C//ratio), W2: (C//ratio, C)). Returns (B, C, H, W)."""
    B, C, H, W = x_nchw.shape
    HW = H * W
    Ch = w1.shape[1]

    # Lane-dense layout: channels last so that C (usually a multiple of 128)
    # lands on the lane axis and stores are unmasked full-width. In an
    # end-to-end NHWC pipeline these transposes are pure layout plumbing and
    # would disappear.
    x_bhwc = jnp.transpose(x_nchw, (0, 2, 3, 1)).reshape(B, HW, C)
    b1_2d = b1.reshape(1, Ch)
    b2_2d = b2.reshape(1, C)

    elem = jnp.dtype(x_nchw.dtype).itemsize
    slab_bytes = HW * C * elem                    # one (HW, C) image slab
    weight_bytes = (w1.size * jnp.dtype(w1.dtype).itemsize
                    + w2.size * jnp.dtype(w2.dtype).itemsize
                    + b1.size * jnp.dtype(b1.dtype).itemsize
                    + b2.size * jnp.dtype(b2.dtype).itemsize)
    # Double-buffered input + output slabs + pinned weights + slack.
    single_pass_bytes = 4 * slab_bytes + 2 * weight_bytes + (2 << 20)

    # Conservative so the whole-image-per-step blocking also fits v7x (64 MiB
    # physical VMEM) with 2-deep pipelining intact.
    _SINGLE_PASS_BUDGET = 48 * 1024 * 1024

    if not force_two_pass and single_pass_bytes <= _SINGLE_PASS_BUDGET:
        out_bhwc = _se_single_pass(
            x_bhwc, w1, b1_2d, w2, b2_2d,
            vmem_limit_bytes=max(single_pass_bytes, 32 * 1024 * 1024))
    else:
        out_bhwc = _se_two_pass(
            x_bhwc, w1, b1_2d, w2, b2_2d,
            tile_budget_bytes=two_pass_tile_budget_bytes)

    return jnp.transpose(out_bhwc.reshape(B, H, W, C), (0, 3, 1, 2))


def se_attention_ref(x_nchw, w1, b1, w2, b2):
    """Pure-JAX reference matching the PyTorch forward."""
    y = jnp.mean(x_nchw.astype(jnp.float32), axis=(2, 3))        # (B, C)
    h = jnp.maximum(y @ w1 + b1, 0.0)                            # (B, Ch)
    z = jax.nn.sigmoid(h @ w2 + b2)                              # (B, C)
    return x_nchw * z[:, :, None, None]


if __name__ == "__main__":
    # Small shapes consistent with the module: channel divisible by ratio=16.
    B, C, H, W = 2, 32, 16, 16
    ratio = 16
    Ch = C // ratio  # hidden width of the excitation MLP

    key = jax.random.PRNGKey(0)
    kx, kw1, kb1, kw2, kb2 = jax.random.split(key, 5)

    x = jax.random.normal(kx, (B, C, H, W), dtype=jnp.float32)
    w1 = jax.random.normal(kw1, (C, Ch), dtype=jnp.float32) * 0.1
    b1 = jax.random.normal(kb1, (Ch,), dtype=jnp.float32) * 0.1
    w2 = jax.random.normal(kw2, (Ch, C), dtype=jnp.float32) * 0.1
    b2 = jax.random.normal(kb2, (C,), dtype=jnp.float32) * 0.1

    ref = se_attention_ref(x, w1, b1, w2, b2)

    # Default (single-pass) path.
    out = jax.block_until_ready(se_attention(x, w1, b1, w2, b2))
    assert out.shape == (B, C, H, W)
    assert jnp.allclose(out, ref, atol=1e-5, rtol=1e-5), "single-pass mismatch"

    # Exercise the VMEM-constrained two-pass fallback (spatially tiled) too.
    out2 = jax.block_until_ready(
        se_attention(x, w1, b1, w2, b2, force_two_pass=True,
                     two_pass_tile_budget_bytes=32 * 1024))
    assert jnp.allclose(out2, ref, atol=1e-5, rtol=1e-5), "two-pass mismatch"

    print("KERNEL_OK")
</pallas_src>

<mosaic_0001>
module attributes {stable_mosaic.version = 11 : i64} {
  func.func @_se_single_pass_kernel(%arg0: i32, %arg1: memref<1x256x32xf32, #tpu.memory_space<vmem>>, %arg2: memref<32x2xf32, #tpu.memory_space<vmem>>, %arg3: memref<1x2xf32, #tpu.memory_space<vmem>>, %arg4: memref<2x32xf32, #tpu.memory_space<vmem>>, %arg5: memref<1x32xf32, #tpu.memory_space<vmem>>, %arg6: memref<1x256x32xf32, #tpu.memory_space<vmem>>) attributes {dimension_semantics = [#tpu.dimension_semantics<parallel>], iteration_bounds = array<i64: 2>, scalar_prefetch = 0 : i64, scratch_operands = 0 : i64, tpu.core_type = #tpu.core_type<tc>, window_params = [{transform_indices = @transform_0, window_bounds = array<i64: 1, 256, 32>}, {pipeline_mode = #tpu.pipeline_mode<synchronous>, transform_indices = @transform_1, window_bounds = array<i64: 32, 2>}, {pipeline_mode = #tpu.pipeline_mode<synchronous>, transform_indices = @transform_2, window_bounds = array<i64: 1, 2>}, {pipeline_mode = #tpu.pipeline_mode<synchronous>, transform_indices = @transform_3, window_bounds = array<i64: 2, 32>}, {pipeline_mode = #tpu.pipeline_mode<synchronous>, transform_indices = @transform_4, window_bounds = array<i64: 1, 32>}, {transform_indices = @transform_5, window_bounds = array<i64: 1, 256, 32>}]} {
    %c0 = arith.constant 0 : index
    %c0_0 = arith.constant 0 : index
    %c0_1 = arith.constant 0 : index
    %0 = vector.load %arg1[%c0, %c0_0, %c0_1] : memref<1x256x32xf32, #tpu.memory_space<vmem>>, vector<1x256x32xf32>
    %1 = vector.shape_cast %0 : vector<1x256x32xf32> to vector<256x32xf32>
    %cst = arith.constant 1.000000e+00 : f32
    %2 = vector.broadcast %cst : f32 to vector<1x256xf32>
    %cst_2 = arith.constant dense<0.000000e+00> : vector<1x32xf32>
    %3 = tpu.matmul %2, %1, %cst_2 {dimension_numbers = #tpu.dot_dimension_numbers<[1], [0], [0], [1], [0, 0, 1, 1], [], []>} : vector<1x256xf32>, vector<256x32xf32>, vector<1x32xf32> -> vector<1x32xf32>
    %cst_3 = arith.constant 3.906250e-03 : f32
    %4 = vector.broadcast %cst_3 : f32 to vector<1x32xf32>
    %5 = arith.mulf %3, %4 : vector<1x32xf32>
    %c0_4 = arith.constant 0 : index
    %c0_5 = arith.constant 0 : index
    %6 = vector.load %arg2[%c0_4, %c0_5] : memref<32x2xf32, #tpu.memory_space<vmem>>, vector<32x2xf32>
    %cst_6 = arith.constant dense<0.000000e+00> : vector<1x2xf32>
    %7 = tpu.matmul %5, %6, %cst_6 {dimension_numbers = #tpu.dot_dimension_numbers<[1], [0], [0], [1], [0, 0, 1, 1], [], []>} : vector<1x32xf32>, vector<32x2xf32>, vector<1x2xf32> -> vector<1x2xf32>
    %c0_7 = arith.constant 0 : index
    %c0_8 = arith.constant 0 : index
    %8 = vector.load %arg3[%c0_7, %c0_8] : memref<1x2xf32, #tpu.memory_space<vmem>>, vector<1x2xf32>
    %9 = arith.addf %7, %8 : vector<1x2xf32>
    %cst_9 = arith.constant 0.000000e+00 : f32
    %10 = vector.broadcast %cst_9 : f32 to vector<1x2xf32>
    %11 = arith.maximumf %9, %10 : vector<1x2xf32>
    %c0_10 = arith.constant 0 : index
    %c0_11 = arith.constant 0 : index
    %12 = vector.load %arg4[%c0_10, %c0_11] : memref<2x32xf32, #tpu.memory_space<vmem>>, vector<2x32xf32>
    %cst_12 = arith.constant dense<0.000000e+00> : vector<1x32xf32>
    %13 = tpu.matmul %11, %12, %cst_12 {dimension_numbers = #tpu.dot_dimension_numbers<[1], [0], [0], [1], [0, 0, 1, 1], [], []>} : vector<1x2xf32>, vector<2x32xf32>, vector<1x32xf32> -> vector<1x32xf32>
    %c0_13 = arith.constant 0 : index
    %c0_14 = arith.constant 0 : index
    %14 = vector.load %arg5[%c0_13, %c0_14] : memref<1x32xf32, #tpu.memory_space<vmem>>, vector<1x32xf32>
    %15 = arith.addf %13, %14 : vector<1x32xf32>
    %16 = arith.negf %15 : vector<1x32xf32>
    %17 = math.exp %16 : vector<1x32xf32>
    %cst_15 = arith.constant 1.000000e+00 : f32
    %18 = vector.broadcast %cst_15 : f32 to vector<1x32xf32>
    %19 = arith.addf %18, %17 : vector<1x32xf32>
    %20 = arith.divf %18, %19 : vector<1x32xf32>
    %21 = vector.broadcast %20 : vector<1x32xf32> to vector<256x32xf32>
    %22 = arith.mulf %1, %21 : vector<256x32xf32>
    %c0_16 = arith.constant 0 : index
    %c0_17 = arith.constant 0 : index
    %c0_18 = arith.constant 0 : index
    %23 = vector.load %arg6[%c0_16, %c0_17, %c0_18] : memref<1x256x32xf32, #tpu.memory_space<vmem>>, vector<1x256x32xf32>
    %24 = vector.shape_cast %23 : vector<1x256x32xf32> to vector<256x32xf32>
    %25 = vector.shape_cast %22 : vector<256x32xf32> to vector<1x256x32xf32>
    tpu.vector_store %arg6[%c0_16, %c0_17, %c0_18], %25 {strides = array<i32>} : memref<1x256x32xf32, #tpu.memory_space<vmem>>, vector<1x256x32xf32>,
    return
  }
  func.func @transform_0(%arg0: i32) -> (i32, i32, i32) {
    %c0_i32 = arith.constant 0 : i32
    %c0_i32_0 = arith.constant 0 : i32
    %c0_i32_1 = arith.constant 0 : i32
    return %arg0, %c0_i32, %c0_i32_0 : i32, i32, i32
  }
  func.func @transform_1(%arg0: i32) -> (i32, i32) {
    %c0_i32 = arith.constant 0 : i32
    %c0_i32_0 = arith.constant 0 : i32
    %c0_i32_1 = arith.constant 0 : i32
    return %c0_i32, %c0_i32_0 : i32, i32
  }
  func.func @transform_2(%arg0: i32) -> (i32, i32) {
    %c0_i32 = arith.constant 0 : i32
    %c0_i32_0 = arith.constant 0 : i32
    %c0_i32_1 = arith.constant 0 : i32
    return %c0_i32, %c0_i32_0 : i32, i32
  }
  func.func @transform_3(%arg0: i32) -> (i32, i32) {
    %c0_i32 = arith.constant 0 : i32
    %c0_i32_0 = arith.constant 0 : i32
    %c0_i32_1 = arith.constant 0 : i32
    return %c0_i32, %c0_i32_0 : i32, i32
  }
  func.func @transform_4(%arg0: i32) -> (i32, i32) {
    %c0_i32 = arith.constant 0 : i32
    %c0_i32_0 = arith.constant 0 : i32
    %c0_i32_1 = arith.constant 0 : i32
    return %c0_i32, %c0_i32_0 : i32, i32
  }
  func.func @transform_5(%arg0: i32) -> (i32, i32, i32) {
    %c0_i32 = arith.constant 0 : i32
    %c0_i32_0 = arith.constant 0 : i32
    %c0_i32_1 = arith.constant 0 : i32
    return %arg0, %c0_i32, %c0_i32_0 : i32, i32, i32
  }
}

</mosaic_0001>

<bundles_post_ra>
// kernel: tpu_custom_call.1
= control target key start
LH: loop header
LB: loop body
LE: loop exit
PB: predicated region body
PF: predicated region fallthrough
CT: control target
= control target key end

     0   :  { %s788_s18 = smov 0   ;;  %s1064_s0 = inlined_call_operand.vmem [shape: f32[2,256,32], index: 0, kind: input, shape index: {}]   ;;  %s1065_s1 = inlined_call_operand.vmem [shape: f32[32,2], index: 1, kind: input, shape index: {}]   ;;  %s1066_s2 = inlined_call_operand.vmem [shape: f32[1,2], index: 2, kind: input, shape index: {}]   ;;  %s1067_s3 = inlined_call_operand.vmem [shape: f32[2,32], index: 3, kind: input, shape index: {}]   ;;  %s1068_s4 = inlined_call_operand.vmem [shape: f32[1,32], index: 4, kind: input, shape index: {}]   ;;  %s1069_s5 = inlined_call_operand.vmem [shape: f32[2,256,32], index: 5, kind: output, shape index: {}]  }
   0x1 LB: > { %s617_s19 = sadd.s32 4294967295, %s752_s18   ;;  %p621_p0 = scmp.ge.s32.totalorder %s752_s18, 1  ;;  %s752_s18 = sphi %s788_s18, %s15_s18  }
   0x2   : > { %p187_p1 = scmp.lt.s32.totalorder %s752_s18, 3 }
   0x4   : > { %p188_p2 = pnand %p621_p0, %p187_p1 }
   0x5   : > { %p215_p3 = scmp.lt.s32.totalorder (!%p188_p2), %s617_s19, 1  ;;  %v328_v0 = vld [vmem:[%s1065_s1] sm:$0xff] (!%p188_p2)  ;;  %v329_v1 = vld [vmem:[%s1065_s1 + $0x8] sm:$0xff] (!%p188_p2)  ;;  %v754_v2 = vmov (!%p188_p2), 1.0   ;;  %v755_v3 = vmov (!%p188_p2), 0.0|0.0   ;;  %v330_v53 = vld [vmem:[%s1065_s1 + $0x10] sm:$0xff] (!%p188_p2) }
   0x6   : > { %191 = sbr.rel (%p188_p2) target bundleno = 745 (0x2e9), region = 40  ;;  %321 = vmatprep.mubr.f32.mxu0 (!%p188_p2), %v754_v2  ;;  %724 = vmatprep.subr.bf16.mxu1 (!%p188_p2), %v755_v3  ;;  %v725_v4 = vpack.c.bf16 (!%p188_p2), %v329_v1, %v328_v0  ;;  %v331_v54 = vld [vmem:[%s1065_s1 + $0x18] sm:$0xff] (!%p188_p2)  ;;  %vm756_vm0 = vmmov (!%p188_p2), 0   ;;  %v757_v56 = vmov (!%p188_p2), 0.0   ;;  %vm333_vm1 = vcmask (!%p188_p2), 261120  }
   0x7   : > { %v728_v55 = vpack.c.bf16 (!%p188_p2), %v331_v54, %v330_v53  ;;  %684 = vmatprep.mubr.msk.f32.mxu1 (!%p188_p2), %vm756_vm0, %v757_v56  ;;  %v408_v61 = vld [vmem:[%s1067_s3] sm:$0x3] (!%p188_p2)  ;;  %vm414_vm2 = vcmask (!%p188_p2), 1041408   ;;  %vm410_vm3 = vcmask (!%p188_p2), 15360  }
   0x8   : > { %726 = vmatpush3.bf16.msra.mxu1 (!%p188_p2), %v725_v4  ;;  %v332_v62 = vld [vmem:[%s1066_s2] sm:$0x1] (!%p188_p2) }
   0x9   : > { %727 = vmatprep.subr.bf16.mxu1 (!%p188_p2), %v755_v3  ;;  %v409_v3 = vld [vmem:[%s1068_s4] sm:$0x1] (!%p188_p2) }
   0xc   : > { %729 = vmatpush3.bf16.msra.mxu1 (!%p188_p2), %v728_v55 }
   0xd   : > { %s1071_s19 = smov (!%p215_p3, %s617_s19), 1  ;;  %687 = vmatprep.subr.mxu1 %v757_v56 }
   0xe   : > { %s632_s24 = sshll.u32 %s1071_s19, 8 }
   0xf   : > { %s811_s27 = scalar_lea.vmem %s1064_s0, %s632_s24  ;;  %s963_s15 = scalar_lea.vmem %s1069_s5, %s632_s24 }
  0x10   : > { %v814_v5 = vld [vmem:[%s811_s27 + $0x80] sm:$0xff]  ;;  %v817_v6 = vld [vmem:[%s811_s27 + $0x88] sm:$0xff]  ;;  %v828_v10 = vld [vmem:[%s811_s27 + $0x90] sm:$0xff] }
  0x11   : > { %v820_v7 = vld [vmem:[%s811_s27] sm:$0xff]  ;;  %v692_v8 = vpack.c.bf16 %v817_v6, %v814_v5  ;;  %v825_v9 = vld [vmem:[%s811_s27 + $0x8] sm:$0xff]  ;;  %v831_v11 = vld [vmem:[%s811_s27 + $0x98] sm:$0xff] }
  0x12   : > { %v694_v12 = vpack.c.bf16 %v825_v9, %v820_v7  ;;  %v696_v13 = vpack.c.bf16 %v831_v11, %v828_v10  ;;  %v838_v14 = vld [vmem:[%s811_s27 + $0x10] sm:$0xff]  ;;  %v841_v15 = vld [vmem:[%s811_s27 + $0x18] sm:$0xff]  ;;  %v844_v16 = vld [vmem:[%s811_s27 + $0xa0] sm:$0xff] }
  0x13   : > { %693 = vmatprep.subr.bf16.mxu0 %v692_v8  ;;  %v847_v17 = vld [vmem:[%s811_s27 + $0xa8] sm:$0xff]  ;;  %v698_v18 = vpack.c.bf16 %v841_v15, %v838_v14  ;;  %v854_v20 = vld [vmem:[%s811_s27 + $0x20] sm:$0xff]  ;;  %v860_v22 = vld [vmem:[%s811_s27 + $0xb0] sm:$0xff] }
  0x14   : > { %695 = vmatpush3.bf16.msra.mxu0 %v694_v12  ;;  %v700_v19 = vpack.c.bf16 %v847_v17, %v844_v16  ;;  %v857_v21 = vld [vmem:[%s811_s27 + $0x28] sm:$0xff]  ;;  %v863_v23 = vld [vmem:[%s811_s27 + $0xb8] sm:$0xff]  ;;  %v870_v26 = vld [vmem:[%s811_s27 + $0x30] sm:$0xff] }
  0x15   : > { %697 = vmatprep.subr.bf16.mxu0 %v696_v13  ;;  %v702_v24 = vpack.c.bf16 %v857_v21, %v854_v20  ;;  %v704_v25 = vpack.c.bf16 %v863_v23, %v860_v22  ;;  %v873_v27 = vld [vmem:[%s811_s27 + $0x38] sm:$0xff]  ;;  %v876_v28 = vld [vmem:[%s811_s27 + $0xc0] sm:$0xff]  ;;  %v879_v29 = vld [vmem:[%s811_s27 + $0xc8] sm:$0xff] }
  0x16   : > { %v706_v30 = vpack.c.bf16 %v873_v27, %v870_v26  ;;  %v708_v31 = vpack.c.bf16 %v879_v29, %v876_v28  ;;  %v886_v32 = vld [vmem:[%s811_s27 + $0x40] sm:$0xff]  ;;  %v889_v33 = vld [vmem:[%s811_s27 + $0x48] sm:$0xff]  ;;  %v892_v34 = vld [vmem:[%s811_s27 + $0xd0] sm:$0xff] }
  0x17   : > { %v895_v35 = vld [vmem:[%s811_s27 + $0xd8] sm:$0xff]  ;;  %v710_v36 = vpack.c.bf16 %v889_v33, %v886_v32  ;;  %v902_v38 = vld [vmem:[%s811_s27 + $0x50] sm:$0xff]  ;;  %v908_v40 = vld [vmem:[%s811_s27 + $0xe0] sm:$0xff] }
  0x18   : > { %699 = vmatpush3.bf16.msra.mxu0 %v698_v18  ;;  %v712_v37 = vpack.c.bf16 %v895_v35, %v892_v34  ;;  %v905_v39 = vld [vmem:[%s811_s27 + $0x58] sm:$0xff]  ;;  %v911_v41 = vld [vmem:[%s811_s27 + $0xe8] sm:$0xff]  ;;  %v918_v44 = vld [vmem:[%s811_s27 + $0x60] sm:$0xff] }
  0x19   : > { %701 = vmatprep.subr.bf16.mxu0 %v700_v19  ;;  %v714_v42 = vpack.c.bf16 %v905_v39, %v902_v38  ;;  %v716_v43 = vpack.c.bf16 %v911_v41, %v908_v40  ;;  %v921_v45 = vld [vmem:[%s811_s27 + $0x68] sm:$0xff]  ;;  %v924_v46 = vld [vmem:[%s811_s27 + $0xf0] sm:$0xff]  ;;  %v927_v47 = vld [vmem:[%s811_s27 + $0xf8] sm:$0xff] }
  0x1a   : > { %v718_v48 = vpack.c.bf16 %v921_v45, %v918_v44  ;;  %v720_v49 = vpack.c.bf16 %v927_v47, %v924_v46  ;;  %v934_v50 = vld [vmem:[%s811_s27 + $0x70] sm:$0xff]  ;;  %v937_v51 = vld [vmem:[%s811_s27 + $0x78] sm:$0xff] }
  0x1b   : > { %v722_v52 = vpack.c.bf16 %v937_v51, %v934_v50 }
  0x1c   : > { %703 = vmatpush3.bf16.msra.mxu0 %v702_v24  ;;  %v494_v24 = vlaneseq }
  0x1d   : > { %705 = vmatprep.subr.bf16.mxu0 %v704_v25 }
  0x1e   : > { %v495_v25 = vshrl.u32 %v494_v24, 7 }
  0x20   : > { %707 = vmatpush3.bf16.msra.mxu0 %v706_v30  ;;  %v496_v30 = vsub.s32 0, %v495_v25 }
  0x21   : > { %709 = vmatprep.subr.bf16.mxu0 %v708_v31 }
  0x24   : > { %711 = vmatpush3.bf16.msra.mxu0 %v710_v36 }
  0x25   : > { %713 = vmatprep.subr.bf16.mxu0 %v712_v37 }
  0x28   : > { %715 = vmatpush3.bf16.msra.mxu0 %v714_v42 }
  0x29   : > { %717 = vmatprep.subr.bf16.mxu0 %v716_v43 }
  0x2c   : > { %719 = vmatpush3.bf16.msra.mxu0 %v718_v48 }
  0x2d   : > { %721 = vmatprep.subr.bf16.mxu0 %v720_v49 }
  0x30   : > { %723 = vmatpush3.bf16.msra.mxu0 %v722_v52 }
  0x33   : > { %322 = vmatmul.mubr.f32.vlgmr.msra.gmra.mrb[0].mxu0 %v754_v2 }
 0x106   : > { %v666_v57 = vpop.f32.mrb[0].mxu0 }
 0x107   : > { %v667_v58 = vpop.f32.mrb[1].mxu0 }
 0x108   : > { %v668_v59 = vadd.f32 %v667_v58, %v666_v57 }
 0x10a   : > { %v327_v60 = vmul.f32 0.00390625, %v668_v59 }
 0x10c   : > { %685 = vmatmul.mubr.msk.f32.vlgmr.msra.gmra.mrb[0].mxu1 %vm333_vm1, %v327_v60 }
 0x10d   : > { %689 = vmatprep.mubr.msk.f32.mxu1 %vm756_vm0, %v757_v56  ;;  %688 = vmatpush3.msk.msra.mxu1 %vm414_vm2, %v408_v61 }
 0x1df   : > { %v403_v63 = vpop.f32.mrb[0].mxu1 }
 0x1e0   : > { %v404_v0 = vadd.f32 %v403_v63, %v332_v62  ;;  %v686_v1 = vpop.f32.mrb[1].mxu1 }
 0x1e2   : > { %v407_v2 = vmax.f32 %v404_v0, 0.0 }
 0x1e4   : > { %690 = vmatmul.mubr.msk.f32.vlgmr.msra.gmra.mrb[2].mxu1 %vm410_vm3, %v407_v2 }
 0x2b7   : > { %v484_v4 = vpop.f32.mrb[2].mxu1 }
 0x2b8   : > { %v485_v8 = vadd.f32 %v484_v4, %v409_v3  ;;  %v691_v12 = vpop.f32.mrb[3].mxu1 }
 0x2ba   : > { %v629_v13 = vmul.f32 -1.442695, %v485_v8 }
 0x2bc   : > { %742 = vpow2.f32 %v629_v13 }
 0x2c6   : > { %v743_v18 = vpop.eup %742 }
 0x2c7   : > { %v491_v19 = vadd.f32 1.0, %v743_v18 }
 0x2c9   : > { %744 = vrcp.f32 %v491_v19 }
 0x2d3   : > { %v745_v31 = vpop.eup %744 }
 0x2d4   : > { %v497_v36 = vrot.slane %v745_v31, %v496_v30 }
 0x2d6   : > { %v498_v37 = vmul.f32 %v497_v36, %v820_v7  ;;  %v499_v42 = vmul.f32 %v497_v36, %v825_v9  ;;  %v500_v43 = vmul.f32 %v497_v36, %v838_v14  ;;  %v501_v48 = vmul.f32 %v497_v36, %v841_v15 }
 0x2d7   : > { %v502_v49 = vmul.f32 %v497_v36, %v854_v20  ;;  %v503_v52 = vmul.f32 %v497_v36, %v857_v21  ;;  %v504_v53 = vmul.f32 %v497_v36, %v870_v26  ;;  %v505_v54 = vmul.f32 %v497_v36, %v873_v27 }
 0x2d8   : > { %v506_v7 = vmul.f32 %v497_v36, %v886_v32  ;;  %v507_v9 = vmul.f32 %v497_v36, %v889_v33  ;;  %v508_v14 = vmul.f32 %v497_v36, %v902_v38  ;;  %v509_v15 = vmul.f32 %v497_v36, %v905_v39  ;;  %530 = vst.msk [vmem:[%s963_s15] sm:$0xff] %vm333_vm1, %v498_v37 }
 0x2d9   : > { %531 = vst.msk [vmem:[%s963_s15 + $0x8] sm:$0xff] %vm333_vm1, %v499_v42  ;;  %532 = vst.msk [vmem:[%s963_s15 + $0x10] sm:$0xff] %vm333_vm1, %v500_v43  ;;  %v510_v20 = vmul.f32 %v497_v36, %v918_v44  ;;  %v511_v21 = vmul.f32 %v497_v36, %v921_v45  ;;  %v512_v26 = vmul.f32 %v497_v36, %v934_v50 }
 0x2da   : > { %533 = vst.msk [vmem:[%s963_s15 + $0x18] sm:$0xff] %vm333_vm1, %v501_v48  ;;  %v513_v27 = vmul.f32 %v497_v36, %v937_v51  ;;  %534 = vst.msk [vmem:[%s963_s15 + $0x20] sm:$0xff] %vm333_vm1, %v502_v49  ;;  %v514_v32 = vmul.f32 %v497_v36, %v814_v5  ;;  %v515_v33 = vmul.f32 %v497_v36, %v817_v6 }
 0x2db   : > { %535 = vst.msk [vmem:[%s963_s15 + $0x28] sm:$0xff] %vm333_vm1, %v503_v52  ;;  %536 = vst.msk [vmem:[%s963_s15 + $0x30] sm:$0xff] %vm333_vm1, %v504_v53  ;;  %v516_v38 = vmul.f32 %v497_v36, %v828_v10  ;;  %v517_v39 = vmul.f32 %v497_v36, %v831_v11  ;;  %v518_v5 = vmul.f32 %v497_v36, %v844_v16 }
 0x2dc   : > { %537 = vst.msk [vmem:[%s963_s15 + $0x38] sm:$0xff] %vm333_vm1, %v505_v54  ;;  %538 = vst.msk [vmem:[%s963_s15 + $0x40] sm:$0xff] %vm333_vm1, %v506_v7  ;;  %v519_v6 = vmul.f32 %v497_v36, %v847_v17  ;;  %v520_v10 = vmul.f32 %v497_v36, %v860_v22  ;;  %v521_v11 = vmul.f32 %v497_v36, %v863_v23 }
 0x2dd   : > { %539 = vst.msk [vmem:[%s963_s15 + $0x48] sm:$0xff] %vm333_vm1, %v507_v9  ;;  %540 = vst.msk [vmem:[%s963_s15 + $0x50] sm:$0xff] %vm333_vm1, %v508_v14  ;;  %v522_v16 = vmul.f32 %v497_v36, %v876_v28  ;;  %v523_v17 = vmul.f32 %v497_v36, %v879_v29  ;;  %v524_v22 = vmul.f32 %v497_v36, %v892_v34 }
 0x2de   : > { %541 = vst.msk [vmem:[%s963_s15 + $0x58] sm:$0xff] %vm333_vm1, %v509_v15  ;;  %542 = vst.msk [vmem:[%s963_s15 + $0x60] sm:$0xff] %vm333_vm1, %v510_v20  ;;  %v525_v23 = vmul.f32 %v497_v36, %v895_v35  ;;  %v526_v28 = vmul.f32 %v497_v36, %v908_v40  ;;  %v527_v29 = vmul.f32 %v497_v36, %v911_v41 }
 0x2df   : > { %543 = vst.msk [vmem:[%s963_s15 + $0x68] sm:$0xff] %vm333_vm1, %v511_v21  ;;  %544 = vst.msk [vmem:[%s963_s15 + $0x70] sm:$0xff] %vm333_vm1, %v512_v26  ;;  %v528_v34 = vmul.f32 %v497_v36, %v924_v46  ;;  %v529_v35 = vmul.f32 %v497_v36, %v927_v47 }
 0x2e0   : > { %545 = vst.msk [vmem:[%s963_s15 + $0x78] sm:$0xff] %vm333_vm1, %v513_v27  ;;  %546 = vst.msk [vmem:[%s963_s15 + $0x80] sm:$0xff] %vm333_vm1, %v514_v32 }
 0x2e1   : > { %547 = vst.msk [vmem:[%s963_s15 + $0x88] sm:$0xff] %vm333_vm1, %v515_v33  ;;  %548 = vst.msk [vmem:[%s963_s15 + $0x90] sm:$0xff] %vm333_vm1, %v516_v38 }
 0x2e2   : > { %549 = vst.msk [vmem:[%s963_s15 + $0x98] sm:$0xff] %vm333_vm1, %v517_v39  ;;  %550 = vst.msk [vmem:[%s963_s15 + $0xa0] sm:$0xff] %vm333_vm1, %v518_v5 }
 0x2e3   : > { %551 = vst.msk [vmem:[%s963_s15 + $0xa8] sm:$0xff] %vm333_vm1, %v519_v6  ;;  %552 = vst.msk [vmem:[%s963_s15 + $0xb0] sm:$0xff] %vm333_vm1, %v520_v10 }
 0x2e4   : > { %553 = vst.msk [vmem:[%s963_s15 + $0xb8] sm:$0xff] %vm333_vm1, %v521_v11  ;;  %554 = vst.msk [vmem:[%s963_s15 + $0xc0] sm:$0xff] %vm333_vm1, %v522_v16 }
 0x2e5   : > { %555 = vst.msk [vmem:[%s963_s15 + $0xc8] sm:$0xff] %vm333_vm1, %v523_v17  ;;  %556 = vst.msk [vmem:[%s963_s15 + $0xd0] sm:$0xff] %vm333_vm1, %v524_v22 }
 0x2e6   : > { %557 = vst.msk [vmem:[%s963_s15 + $0xd8] sm:$0xff] %vm333_vm1, %v525_v23  ;;  %558 = vst.msk [vmem:[%s963_s15 + $0xe0] sm:$0xff] %vm333_vm1, %v526_v28 }
 0x2e7   : > { %559 = vst.msk [vmem:[%s963_s15 + $0xe8] sm:$0xff] %vm333_vm1, %v527_v29  ;;  %560 = vst.msk [vmem:[%s963_s15 + $0xf0] sm:$0xff] %vm333_vm1, %v528_v34 }
 0x2e8   : > { %561 = vst.msk [vmem:[%s963_s15 + $0xf8] sm:$0xff] %vm333_vm1, %v529_v35 }
 0x2e9 PF: > { %s15_s18 = sadd.s32 1, %s752_s18  }
 0x2ea   : > { %p12_p4 = scmp.ge.s32.totalorder %s15_s18, 4  }
 0x2ec   :  { %14 = sbr.rel (!%p12_p4) target bundleno = 1 (0x1), region = 70 }

</bundles_post_ra>
